<compile_context>
chip_gen: v7x
topology: tpu7x:2x2x1
jax: 0.10.0
libtpu: 0.0.40
codegen_flags: <defaults>
</compile_context>

<pallas_src>
import math

import jax
import jax.numpy as jnp
import numpy as np
from jax.experimental import pallas as pl
from jax.experimental.pallas import tpu as pltpu

# ---------------- problem sizes (small, deterministic) ----------------
N = 2        # batch
CIN = 4      # input channels
H = W = 16   # spatial
HID = 32     # base hidden channels
NCLS = 8     # seg classes ("size" arg of DT)
UP = 2       # upsample factor of `up`
HOUT, WOUT = H * UP, W * UP
HW = H * W             # 256  -> lane axis (per batch element)
NHW = N * HW           # 512  -> batch folded into lanes for base/seg
HWOUT = HOUT * WOUT    # 1024 -> lane axis of the upsampled output
KK = 9 * CIN           # 36   -> raw im2col contraction depth
KKP = 48               # padded depth; row KK is the constant-1 bias row
NJ = 4                 # number of uk / output column tiles (pipelined grid)
TJ = HWOUT // NJ       # 256 lanes per column tile


# ----------------------------- kernel ----------------------------------
def dt_fused_kernel(p_ref, wb_ref, ws_ref, bs_ref, uk_ref, o_ref, st_ref):
    """Whole batch end-to-end; grid axis j tiles the upsample columns.

    p_ref : (KKP, N*HW)   f32  im2col patches (+ ones row, zero pad rows)
    wb_ref: (HID, KKP)    f32  base conv weight (+ bias column, zero pad cols)
    ws_ref: (NCLS, HID)   f32  seg 1x1 weight
    bs_ref: (NCLS, 1)     f32  seg bias
    uk_ref: (HW, TJ)      bf16 column tile of kron(Uh, Uw)^T (exact in bf16)
    o_ref : (N*NCLS, TJ)  f32  output column tile
    st_ref: (N*NCLS, HW)  f32  scratch: seg logits, batch stacked on sublanes
    """
    @pl.when(pl.program_id(0) == 0)
    def _():
        # base: 3x3 conv (+ folded bias) as one im2col matmul, then ReLU
        h = jnp.dot(wb_ref[...], p_ref[...],
                    preferred_element_type=jnp.float32)            # (HID, 512)
        h = jnp.maximum(h, 0.0)
        # seg: 1x1 conv == channel matmul + bias
        s = jnp.dot(ws_ref[...], h,
                    preferred_element_type=jnp.float32) + bs_ref[...]  # (NCLS, 512)
        # fold batch from lanes (128-aligned slices) into sublanes: (N*NCLS, HW)
        st_ref[0:NCLS, :] = s[:, 0:HW]
        st_ref[NCLS:2 * NCLS, :] = s[:, HW:2 * HW]

    # up: depthwise bilinear transposed conv == one lane-dense matmul per tile
    uk = uk_ref[...].astype(jnp.float32)                           # exact cast
    o_ref[...] = jnp.dot(st_ref[...], uk,
                         preferred_element_type=jnp.float32)       # (16, TJ)


# ----------------------------- wrapper ----------------------------------
def dt_pallas(patches, wb, ws, bs, uk):
    return pl.pallas_call(
        dt_fused_kernel,
        out_shape=jax.ShapeDtypeStruct((N * NCLS, HWOUT), jnp.float32),
        grid=(NJ,),
        in_specs=[
            pl.BlockSpec((KKP, NHW), lambda j: (0, 0)),
            pl.BlockSpec((HID, KKP), lambda j: (0, 0)),
            pl.BlockSpec((NCLS, HID), lambda j: (0, 0)),
            pl.BlockSpec((NCLS, 1), lambda j: (0, 0)),
            pl.BlockSpec((HW, TJ), lambda j: (0, j)),   # pipelined uk column tiles
        ],
        out_specs=pl.BlockSpec((N * NCLS, TJ), lambda j: (0, j)),
        scratch_shapes=[pltpu.VMEM((N * NCLS, HW), jnp.float32)],
        compiler_params=pltpu.CompilerParams(
            dimension_semantics=("arbitrary",)),  # scratch carried across tiles
    )(patches, wb, ws, bs, uk)


# ------------------- parameters (deterministic init) --------------------
def bilinear_upsample_matrix(hin, factor):
    """1-D linear map of ConvTranspose(k=2f, stride=f, pad=f//2) with the
    DRN `fill_up_weights` bilinear kernel."""
    k = 2 * factor
    pad = factor // 2
    hout = hin * factor
    f = math.ceil(k / 2)
    c = (2 * f - 1 - f % 2) / (2.0 * f)
    w1 = np.array([1.0 - abs(i / f - c) for i in range(k)], dtype=np.float32)
    U = np.zeros((hout, hin), np.float32)
    for iy in range(hin):
        for ky in range(k):
            oy = iy * factor - pad + ky
            if 0 <= oy < hout:
                U[oy, iy] += w1[ky]
    return jnp.asarray(U)


def init_params(key):
    k1, k2, k3, k4 = jax.random.split(key, 4)
    w_base = jax.random.normal(k1, (3, 3, CIN, HID), jnp.float32) * 0.1
    b_base = jax.random.normal(k2, (1, HID), jnp.float32) * 0.1
    w_seg = jax.random.normal(k3, (HID, NCLS), jnp.float32) * 0.1
    b_seg = jax.random.normal(k4, (1, NCLS), jnp.float32) * 0.1
    uh = bilinear_upsample_matrix(H, UP)
    uw = bilinear_upsample_matrix(W, UP)
    return dict(w_base=w_base, b_base=b_base, w_seg=w_seg, b_seg=b_seg,
                uh=uh, uw=uw)


def prepare_params(p):
    """One-time re-layout of raw params into kernel-ready arrays (all f32
    except uk, which is exact in bf16)."""
    # base weight -> (HID, KK), column order (kh, kw, c) matches im2col rows;
    # append the bias as column KK and zero-pad depth to KKP.
    wb = p["w_base"].reshape(KK, HID).T                                  # (HID, 36)
    wb = jnp.concatenate(
        [wb, p["b_base"].T, jnp.zeros((HID, KKP - KK - 1), jnp.float32)],
        axis=1)                                                          # (HID, 48)
    ws = p["w_seg"].T.astype(jnp.float32)                                # (NCLS, HID)
    bs = p["b_seg"].reshape(NCLS, 1).astype(jnp.float32)
    # kron(Uh, Uw)^T: rows indexed by (i*W + j), cols by (oy*WOUT + ox).
    # Entries are products of {0, 0.25, 0.75} -> exact in bf16.
    ukt = jnp.einsum("yi,xj->ijyx", p["uh"], p["uw"]).reshape(HW, HWOUT)
    uk = ukt.astype(jnp.bfloat16)
    return dict(wb=wb, ws=ws, bs=bs, uk=uk)


# --------------------------- full forward -------------------------------
def dt_forward(x_nchw, kp):
    """NCHW in / NCHW out; channels-first, lane-dense layouts inside."""
    x = x_nchw.astype(jnp.float32)
    xp = jnp.pad(x, ((0, 0), (0, 0), (1, 1), (1, 1)))                    # halo pad
    # im2col: tap order (kh, kw, c), spatial flattened h*W + w
    taps = [xp[:, :, kh:kh + H, kw:kw + W] for kh in range(3) for kw in range(3)]
    pat = jnp.stack(taps, axis=1).reshape(N, KK, HW)                     # (N, 36, 256)
    pat = jnp.transpose(pat, (1, 0, 2)).reshape(KK, NHW)                 # (36, 512)
    ones = jnp.ones((1, NHW), jnp.float32)                               # bias row
    zpad = jnp.zeros((KKP - KK - 1, NHW), jnp.float32)
    patches = jnp.concatenate([pat, ones, zpad], axis=0)                 # (48, 512)
    y = dt_pallas(patches, kp["wb"], kp["ws"], kp["bs"], kp["uk"])       # (16, 1024)
    return y.reshape(N, NCLS, HOUT, WOUT)                                # free reshape


# Pure-f32 NCHW reference (mirrors the PyTorch module's math directly).
def dt_reference(x_nchw, p):
    x = x_nchw.astype(jnp.float32)
    xp = jnp.pad(x, ((0, 0), (0, 0), (1, 1), (1, 1)))
    acc = jnp.zeros((N, HID, H, W), jnp.float32)
    for kh in range(3):
        for kw in range(3):
            acc = acc + jnp.einsum("nchw,co->nohw",
                                   xp[:, :, kh:kh + H, kw:kw + W],
                                   p["w_base"][kh, kw])
    h = jnp.maximum(acc + p["b_base"].reshape(1, HID, 1, 1), 0.0)
    s = jnp.einsum("nchw,co->nohw", h, p["w_seg"]) + p["b_seg"].reshape(1, NCLS, 1, 1)
    t = jnp.einsum("yi,nciw->ncyw", p["uh"], s)
    y = jnp.einsum("xj,ncyj->ncyx", p["uw"], t)
    return y


if __name__ == "__main__":
    key = jax.random.PRNGKey(0)
    kx, kp = jax.random.split(key)
    x = jax.random.normal(kx, (N, CIN, H, W), jnp.float32)
    raw = init_params(kp)
    prepared = prepare_params(raw)

    fwd = jax.jit(dt_forward)
    out = jax.block_until_ready(fwd(x, prepared))

    ref = dt_reference(x, raw)
    assert out.shape == (N, NCLS, HOUT, WOUT), out.shape
    out_np = np.asarray(out)
    ref_np = np.asarray(jax.block_until_ready(ref))
    max_err = float(np.max(np.abs(out_np - ref_np)))
    # Tolerance covers MXU default-precision f32 matmuls vs. XLA's einsum path.
    assert np.allclose(out_np, ref_np, atol=1e-2, rtol=1e-2), (
        f"mismatch vs reference, max abs err {max_err}")

    print("KERNEL_OK")
</pallas_src>

<mosaic_0001>
module attributes {stable_mosaic.version = 11 : i64} {
  func.func @dt_fused_kernel(%arg0: i32, %arg1: memref<48x512xf32, #tpu.memory_space<vmem>>, %arg2: memref<32x48xf32, #tpu.memory_space<vmem>>, %arg3: memref<8x32xf32, #tpu.memory_space<vmem>>, %arg4: memref<8x1xf32, #tpu.memory_space<vmem>>, %arg5: memref<256x256xbf16, #tpu.memory_space<vmem>>, %arg6: memref<16x256xf32, #tpu.memory_space<vmem>>, %arg7: memref<16x256xf32, #tpu.memory_space<vmem>>) attributes {dimension_semantics = [#tpu.dimension_semantics<arbitrary>], iteration_bounds = array<i64: 4>, scalar_prefetch = 0 : i64, scratch_operands = 1 : i64, tpu.core_type = #tpu.core_type<tc>, window_params = [{pipeline_mode = #tpu.pipeline_mode<synchronous>, transform_indices = @transform_0, window_bounds = array<i64: 48, 512>}, {pipeline_mode = #tpu.pipeline_mode<synchronous>, transform_indices = @transform_1, window_bounds = array<i64: 32, 48>}, {pipeline_mode = #tpu.pipeline_mode<synchronous>, transform_indices = @transform_2, window_bounds = array<i64: 8, 32>}, {pipeline_mode = #tpu.pipeline_mode<synchronous>, transform_indices = @transform_3, window_bounds = array<i64: 8, 1>}, {transform_indices = @transform_4, window_bounds = array<i64: 256, 256>}, {transform_indices = @transform_5, window_bounds = array<i64: 16, 256>}]} {
    %c0_i32 = arith.constant 0 : i32
    %0 = arith.cmpi eq, %arg0, %c0_i32 : i32
    %1 = arith.extui %0 : i1 to i32
    %c0_i32_0 = arith.constant 0 : i32
    %2 = arith.cmpi ne, %1, %c0_i32_0 : i32
    scf.if %2 {
      %c0_6 = arith.constant 0 : index
      %c0_7 = arith.constant 0 : index
      %8 = vector.load %arg2[%c0_6, %c0_7] : memref<32x48xf32, #tpu.memory_space<vmem>>, vector<32x48xf32>
      %c0_8 = arith.constant 0 : index
      %c0_9 = arith.constant 0 : index
      %9 = vector.load %arg1[%c0_8, %c0_9] : memref<48x512xf32, #tpu.memory_space<vmem>>, vector<48x512xf32>
      %cst_10 = arith.constant dense<0.000000e+00> : vector<32x512xf32>
      %10 = tpu.matmul %8, %9, %cst_10 {dimension_numbers = #tpu.dot_dimension_numbers<[1], [0], [0], [1], [0, 0, 1, 1], [], []>} : vector<32x48xf32>, vector<48x512xf32>, vector<32x512xf32> -> vector<32x512xf32>
      %cst_11 = arith.constant 0.000000e+00 : f32
      %11 = vector.broadcast %cst_11 : f32 to vector<32x512xf32>
      %12 = arith.maximumf %10, %11 : vector<32x512xf32>
      %c0_12 = arith.constant 0 : index
      %c0_13 = arith.constant 0 : index
      %13 = vector.load %arg3[%c0_12, %c0_13] : memref<8x32xf32, #tpu.memory_space<vmem>>, vector<8x32xf32>
      %cst_14 = arith.constant dense<0.000000e+00> : vector<8x512xf32>
      %14 = tpu.matmul %13, %12, %cst_14 {dimension_numbers = #tpu.dot_dimension_numbers<[1], [0], [0], [1], [0, 0, 1, 1], [], []>} : vector<8x32xf32>, vector<32x512xf32>, vector<8x512xf32> -> vector<8x512xf32>
      %c0_15 = arith.constant 0 : index
      %c0_16 = arith.constant 0 : index
      %15 = vector.load %arg4[%c0_15, %c0_16] : memref<8x1xf32, #tpu.memory_space<vmem>>, vector<8x1xf32>
      %16 = vector.broadcast %15 : vector<8x1xf32> to vector<8x512xf32>
      %17 = arith.addf %14, %16 : vector<8x512xf32>
      %18 = vector.extract_strided_slice %17 {offsets = [0, 0], sizes = [8, 256], strides = [1, 1]} : vector<8x512xf32> to vector<8x256xf32>
      %c0_17 = arith.constant 0 : index
      %c0_18 = arith.constant 0 : index
      %19 = vector.load %arg7[%c0_17, %c0_18] : memref<16x256xf32, #tpu.memory_space<vmem>>, vector<8x256xf32>
      tpu.vector_store %arg7[%c0_17, %c0_18], %18 {strides = array<i32>} : memref<16x256xf32, #tpu.memory_space<vmem>>, vector<8x256xf32>,
      %20 = vector.extract_strided_slice %17 {offsets = [0, 256], sizes = [8, 256], strides = [1, 1]} : vector<8x512xf32> to vector<8x256xf32>
      %c8 = arith.constant 8 : index
      %c0_19 = arith.constant 0 : index
      %21 = vector.load %arg7[%c8, %c0_19] : memref<16x256xf32, #tpu.memory_space<vmem>>, vector<8x256xf32>
      tpu.vector_store %arg7[%c8, %c0_19], %20 {strides = array<i32>} : memref<16x256xf32, #tpu.memory_space<vmem>>, vector<8x256xf32>,
    } else {
    }
    %c0 = arith.constant 0 : index
    %c0_1 = arith.constant 0 : index
    %3 = vector.load %arg5[%c0, %c0_1] : memref<256x256xbf16, #tpu.memory_space<vmem>>, vector<256x256xbf16>
    %4 = arith.extf %3 : vector<256x256xbf16> to vector<256x256xf32>
    %c0_2 = arith.constant 0 : index
    %c0_3 = arith.constant 0 : index
    %5 = vector.load %arg7[%c0_2, %c0_3] : memref<16x256xf32, #tpu.memory_space<vmem>>, vector<16x256xf32>
    %cst = arith.constant dense<0.000000e+00> : vector<16x256xf32>
    %6 = tpu.matmul %5, %4, %cst {dimension_numbers = #tpu.dot_dimension_numbers<[1], [0], [0], [1], [0, 0, 1, 1], [], []>} : vector<16x256xf32>, vector<256x256xf32>, vector<16x256xf32> -> vector<16x256xf32>
    %c0_4 = arith.constant 0 : index
    %c0_5 = arith.constant 0 : index
    %7 = vector.load %arg6[%c0_4, %c0_5] : memref<16x256xf32, #tpu.memory_space<vmem>>, vector<16x256xf32>
    tpu.vector_store %arg6[%c0_4, %c0_5], %6 {strides = array<i32>} : memref<16x256xf32, #tpu.memory_space<vmem>>, vector<16x256xf32>,
    return
  }
  func.func @transform_0(%arg0: i32) -> (i32, i32) {
    %c0_i32 = arith.constant 0 : i32
    %c0_i32_0 = arith.constant 0 : i32
    %c0_i32_1 = arith.constant 0 : i32
    return %c0_i32, %c0_i32_0 : i32, i32
  }
  func.func @transform_1(%arg0: i32) -> (i32, i32) {
    %c0_i32 = arith.constant 0 : i32
    %c0_i32_0 = arith.constant 0 : i32
    %c0_i32_1 = arith.constant 0 : i32
    return %c0_i32, %c0_i32_0 : i32, i32
  }
  func.func @transform_2(%arg0: i32) -> (i32, i32) {
    %c0_i32 = arith.constant 0 : i32
    %c0_i32_0 = arith.constant 0 : i32
    %c0_i32_1 = arith.constant 0 : i32
    return %c0_i32, %c0_i32_0 : i32, i32
  }
  func.func @transform_3(%arg0: i32) -> (i32, i32) {
    %c0_i32 = arith.constant 0 : i32
    %c0_i32_0 = arith.constant 0 : i32
    %c0_i32_1 = arith.constant 0 : i32
    return %c0_i32, %c0_i32_0 : i32, i32
  }
  func.func @transform_4(%arg0: i32) -> (i32, i32) {
    %c0_i32 = arith.constant 0 : i32
    %c0_i32_0 = arith.constant 0 : i32
    return %c0_i32, %arg0 : i32, i32
  }
  func.func @transform_5(%arg0: i32) -> (i32, i32) {
    %c0_i32 = arith.constant 0 : i32
    %c0_i32_0 = arith.constant 0 : i32
    return %c0_i32, %arg0 : i32, i32
  }
}

</mosaic_0001>

<bundles_post_ra>
// kernel: dt_forward.1
= control target key start
LH: loop header
LB: loop body
LE: loop exit
PB: predicated region body
PF: predicated region fallthrough
CT: control target
= control target key end

     0   :  { %s1373_s18 = smov 0   ;;  %s1375_s19 = smov 0   ;;  %s1654_s0 = inlined_call_operand.vmem [shape: f32[48,512], index: 0, kind: input, shape index: {}]   ;;  %s1655_s1 = inlined_call_operand.vmem [shape: f32[32,48], index: 1, kind: input, shape index: {}]   ;;  %s1656_s2 = inlined_call_operand.vmem [shape: f32[8,32], index: 2, kind: input, shape index: {}]   ;;  %s1657_s3 = inlined_call_operand.vmem [shape: f32[8,1], index: 3, kind: input, shape index: {}]   ;;  %s1658_s4 = inlined_call_operand.vmem [shape: bf16[256,1024], index: 4, kind: input, shape index: {}]   ;;  %s1659_s5 = inlined_call_operand.vmem [shape: f32[16,1024], index: 5, kind: output, shape index: {}]  }
   0x1   :  { %s1377_s20 = smov 0  }
   0x2 LB: > { %s1389_s21 = sadd.s32 4294967295, %s1339_s20   ;;  %s1392_s22 = sadd.s32 1, %s1339_s20   ;;  %s1339_s20 = sphi %s1377_s20, %s1663_s20   ;;  %s1335_s19 = sphi %s1375_s19, %s1662_s19   ;;  %s1331_s18 = sphi %s1373_s18, %s1661_s18  }
   0x3   : > { %s103_s23 = ssub.s32 %s1339_s20, %s1392_s22  ;;  %s106_s24 = sadd.s32 1, %s1335_s19 }
   0x4   : > { %p104_p0 = scmp.eq.s32.totalorder %s103_s23, 0  ;;  %p113_p1 = scmp.ne.s32.totalorder %s1335_s19, %s1331_s18 }
   0x5   : > { %p114_p2 = scmp.eq.s32.totalorder %s1339_s20, 0  ;;  %p143_p3 = scmp.eq.s32.totalorder %s1389_s21, 3 }
   0x6   : > { %s1402_s25 = scalar_select %p104_p0, %s1335_s19, %s106_s24  }
   0x7   : > { %p115_p4 = por %p114_p2, %p113_p1  ;;  %p1404_p5 = por %p143_p3, %p113_p1 }
   0x8   : > { %p1049_p6 = scmp.ge.s32.totalorder %s1339_s20, 4 }
   0xa   : > { %177 = sbr.rel (%p1049_p6) target bundleno = 53 (0x35), region = 32 }
  0x11   : > { %180 = sbr.rel (!%p115_p4) target bundleno = 53 (0x35), region = 36  ;;  %s182_s27 = sand.u32 (%p115_p4), 1, %s1335_s19  }
  0x12   : > { %s1072_s28 = sshll.u32 (%p115_p4), %s1339_s20, 3  ;;  %s1050_s29 = sshll.u32 (%p115_p4), %s182_s27, 8 }
  0x13   : > { %s1414_s7 = scalar_lea.vmem (%p115_p4), %s1658_s4, %s1072_s28  ;;  %s1419_s8 = scalar_lea.vmem (%p115_p4), [#allocation3], %s1050_s29 }
  0x14   : > { %v277_v0 = vld [vmem:[%s1414_s7] sm:$0xff] (%p115_p4) }
  0x15   : > { %v279_v1 = vld [vmem:[%s1414_s7 + $0x20] sm:$0xff] (%p115_p4)  ;;  %278 = vst [vmem:[%s1419_s8] sm:$0xff] (%p115_p4), %v277_v0 }
  0x16   : > { %v281_v2 = vld [vmem:[%s1414_s7 + $0x40] sm:$0xff] (%p115_p4)  ;;  %280 = vst [vmem:[%s1419_s8 + $0x8] sm:$0xff] (%p115_p4), %v279_v1 }
  0x17   : > { %282 = vst [vmem:[%s1419_s8 + $0x10] sm:$0xff] (%p115_p4), %v281_v2  ;;  %v283_v3 = vld [vmem:[%s1414_s7 + $0x60] sm:$0xff] (%p115_p4) }
  0x18   : > { %v285_v4 = vld [vmem:[%s1414_s7 + $0x80] sm:$0xff]  ;;  %284 = vst [vmem:[%s1419_s8 + $0x18] sm:$0xff] %v283_v3 }
  0x19   : > { %v287_v5 = vld [vmem:[%s1414_s7 + $0xa0] sm:$0xff]  ;;  %286 = vst [vmem:[%s1419_s8 + $0x20] sm:$0xff] %v285_v4 }
  0x1a   : > { %288 = vst [vmem:[%s1419_s8 + $0x28] sm:$0xff] %v287_v5  ;;  %v289_v6 = vld [vmem:[%s1414_s7 + $0xc0] sm:$0xff] }
  0x1b   : > { %v291_v7 = vld [vmem:[%s1414_s7 + $0xe0] sm:$0xff]  ;;  %290 = vst [vmem:[%s1419_s8 + $0x30] sm:$0xff] %v289_v6 }
  0x1c   : > { %v293_v8 = vld [vmem:[%s1414_s7 + $0x100] sm:$0xff]  ;;  %292 = vst [vmem:[%s1419_s8 + $0x38] sm:$0xff] %v291_v7 }
  0x1d   : > { %294 = vst [vmem:[%s1419_s8 + $0x40] sm:$0xff] %v293_v8  ;;  %v295_v9 = vld [vmem:[%s1414_s7 + $0x120] sm:$0xff] }
  0x1e   : > { %v297_v10 = vld [vmem:[%s1414_s7 + $0x140] sm:$0xff]  ;;  %296 = vst [vmem:[%s1419_s8 + $0x48] sm:$0xff] %v295_v9 }
  0x1f   : > { %v299_v11 = vld [vmem:[%s1414_s7 + $0x160] sm:$0xff]  ;;  %298 = vst [vmem:[%s1419_s8 + $0x50] sm:$0xff] %v297_v10 }
  0x20   : > { %300 = vst [vmem:[%s1419_s8 + $0x58] sm:$0xff] %v299_v11  ;;  %v301_v12 = vld [vmem:[%s1414_s7 + $0x180] sm:$0xff] }
  0x21   : > { %v303_v13 = vld [vmem:[%s1414_s7 + $0x1a0] sm:$0xff]  ;;  %302 = vst [vmem:[%s1419_s8 + $0x60] sm:$0xff] %v301_v12 }
  0x22   : > { %v305_v14 = vld [vmem:[%s1414_s7 + $0x1c0] sm:$0xff]  ;;  %304 = vst [vmem:[%s1419_s8 + $0x68] sm:$0xff] %v303_v13 }
  0x23   : > { %306 = vst [vmem:[%s1419_s8 + $0x70] sm:$0xff] %v305_v14  ;;  %v307_v15 = vld [vmem:[%s1414_s7 + $0x1e0] sm:$0xff] }
  0x24   : > { %v309_v16 = vld [vmem:[%s1414_s7 + $0x200] sm:$0xff]  ;;  %308 = vst [vmem:[%s1419_s8 + $0x78] sm:$0xff] %v307_v15 }
  0x25   : > { %v311_v17 = vld [vmem:[%s1414_s7 + $0x220] sm:$0xff]  ;;  %310 = vst [vmem:[%s1419_s8 + $0x80] sm:$0xff] %v309_v16 }
  0x26   : > { %312 = vst [vmem:[%s1419_s8 + $0x88] sm:$0xff] %v311_v17  ;;  %v313_v18 = vld [vmem:[%s1414_s7 + $0x240] sm:$0xff] }
  0x27   : > { %v315_v19 = vld [vmem:[%s1414_s7 + $0x260] sm:$0xff]  ;;  %314 = vst [vmem:[%s1419_s8 + $0x90] sm:$0xff] %v313_v18 }
  0x28   : > { %v317_v20 = vld [vmem:[%s1414_s7 + $0x280] sm:$0xff]  ;;  %316 = vst [vmem:[%s1419_s8 + $0x98] sm:$0xff] %v315_v19 }
  0x29   : > { %318 = vst [vmem:[%s1419_s8 + $0xa0] sm:$0xff] %v317_v20  ;;  %v319_v21 = vld [vmem:[%s1414_s7 + $0x2a0] sm:$0xff] }
  0x2a   : > { %v321_v22 = vld [vmem:[%s1414_s7 + $0x2c0] sm:$0xff]  ;;  %320 = vst [vmem:[%s1419_s8 + $0xa8] sm:$0xff] %v319_v21 }
  0x2b   : > { %v323_v23 = vld [vmem:[%s1414_s7 + $0x2e0] sm:$0xff]  ;;  %322 = vst [vmem:[%s1419_s8 + $0xb0] sm:$0xff] %v321_v22 }
  0x2c   : > { %324 = vst [vmem:[%s1419_s8 + $0xb8] sm:$0xff] %v323_v23  ;;  %v325_v24 = vld [vmem:[%s1414_s7 + $0x300] sm:$0xff] }
  0x2d   : > { %v327_v25 = vld [vmem:[%s1414_s7 + $0x320] sm:$0xff]  ;;  %326 = vst [vmem:[%s1419_s8 + $0xc0] sm:$0xff] %v325_v24 }
  0x2e   : > { %v329_v26 = vld [vmem:[%s1414_s7 + $0x340] sm:$0xff]  ;;  %328 = vst [vmem:[%s1419_s8 + $0xc8] sm:$0xff] %v327_v25 }
  0x2f   : > { %330 = vst [vmem:[%s1419_s8 + $0xd0] sm:$0xff] %v329_v26  ;;  %v331_v27 = vld [vmem:[%s1414_s7 + $0x360] sm:$0xff] }
  0x30   : > { %v333_v28 = vld [vmem:[%s1414_s7 + $0x380] sm:$0xff]  ;;  %332 = vst [vmem:[%s1419_s8 + $0xd8] sm:$0xff] %v331_v27 }
  0x31   : > { %v335_v29 = vld [vmem:[%s1414_s7 + $0x3a0] sm:$0xff]  ;;  %334 = vst [vmem:[%s1419_s8 + $0xe0] sm:$0xff] %v333_v28 }
  0x32   : > { %336 = vst [vmem:[%s1419_s8 + $0xe8] sm:$0xff] %v335_v29  ;;  %v337_v30 = vld [vmem:[%s1414_s7 + $0x3c0] sm:$0xff] }
  0x33   : > { %v339_v31 = vld [vmem:[%s1414_s7 + $0x3e0] sm:$0xff]  ;;  %338 = vst [vmem:[%s1419_s8 + $0xf0] sm:$0xff] %v337_v30 }
  0x34   : > { %340 = vst [vmem:[%s1419_s8 + $0xf8] sm:$0xff] %v339_v31 }
  0x35 PF: > { %p1053_p7 = scmp.ge.s32.totalorder %s1339_s20, 1  ;;  %p345_p8 = scmp.lt.s32.totalorder %s1339_s20, 5 }
  0x37   : > { %p346_p9 = pnand %p1053_p7, %p345_p8 }
  0x38   : > { %s352_s9 = sand.u32 (!%p346_p9), 1, %s1331_s18   ;;  %p1056_p10 = scmp.ne.s32.totalorder (!%p346_p9), %s1389_s21, 0 }
  0x39   : > { %349 = sbr.rel (%p346_p9) target bundleno = 817 (0x331), region = 74  ;;  %s1054_s10 = sshll.u32 (!%p346_p9), %s352_s9, 8 }
  0x3a   : > { %s1055_s11 = sshll.u32 (!%p346_p9), %s352_s9, 5  ;;  %s1485_s12 = scalar_lea.vmem (!%p346_p9), [#allocation3], %s1054_s10 }
  0x3b   : > { %s1487_s13 = scalar_lea.vmem (!%p346_p9), [#allocation4], %s1055_s11 }
  0x40   : > { %383 = sbr.rel (%p1056_p10) target bundleno = 530 (0x212), region = 82  ;;  %v389_v32 = vld [vmem:[%s1654_s0 + $0x8] sm:$0xff] (!%p1056_p10)  ;;  %v391_v34 = vld [vmem:[%s1654_s0 + $0x18] sm:$0xff] (!%p1056_p10)  ;;  %v388_v37 = vld [vmem:[%s1654_s0] sm:$0xff] (!%p1056_p10)  ;;  %v1341_v39 = vmov (!%p1056_p10), 0.0   ;;  %vm412_vm0 = vcmask (!%p1056_p10), 392192  }
  0x41   : > { %v393_v33 = vld [vmem:[%s1654_s0 + $0x28] sm:$0xff] (!%p1056_p10)  ;;  %v395_v36 = vld [vmem:[%s1654_s0 + $0x38] sm:$0xff] (!%p1056_p10)  ;;  %v392_v38 = vld [vmem:[%s1654_s0 + $0x20] sm:$0xff] (!%p1056_p10)  ;;  %489 = vmatprep.mubr.f32.mxu0 (!%p1056_p10), %v1341_v39  ;;  %578 = vmatprep.mubr.f32.mxu1 (!%p1056_p10), %v1341_v39  ;;  %v1342_v10 = vmov (!%p1056_p10), 0   ;;  %vm626_vm1 = vcmask (!%p1056_p10), 261120  }
  0x42   : > { %v1074_v35 = vpack.c.bf16 (!%p1056_p10), %v393_v33, %v389_v32  ;;  %v1086_v40 = vpack.c.bf16 (!%p1056_p10), %v395_v36, %v391_v34  ;;  %v1076_v41 = vpack.c.bf16 (!%p1056_p10), %v392_v38, %v388_v37  ;;  %v390_v42 = vld [vmem:[%s1654_s0 + $0x10] sm:$0xff] (!%p1056_p10)  ;;  %v397_v44 = vld [vmem:[%s1654_s0 + $0x48] sm:$0xff] (!%p1056_p10)  ;;  %v399_v47 = vld [vmem:[%s1654_s0 + $0x58] sm:$0xff] (!%p1056_p10)  ;;  %1268 = vset.pattern.permute.xlu0 (!%p1056_p10), %v1342_v10 }
  0x43   : > { %v394_v43 = vld [vmem:[%s1654_s0 + $0x30] sm:$0xff] (!%p1056_p10)  ;;  %v401_v46 = vld [vmem:[%s1654_s0 + $0x68] sm:$0xff] (!%p1056_p10)  ;;  %v403_v48 = vld [vmem:[%s1654_s0 + $0x78] sm:$0xff] (!%p1056_p10) }
  0x44   : > { %1075 = vmatprep.subr.bf16.mxu0 (!%p1056_p10), %v1074_v35  ;;  %v1088_v45 = vpack.c.bf16 (!%p1056_p10), %v394_v43, %v390_v42  ;;  %1087 = vmatprep.subr.bf16.mxu1 (!%p1056_p10), %v1086_v40  ;;  %v1078_v49 = vpack.c.bf16 (!%p1056_p10), %v401_v46, %v397_v44  ;;  %v1090_v50 = vpack.c.bf16 (!%p1056_p10), %v403_v48, %v399_v47  ;;  %v396_v51 = vld [vmem:[%s1654_s0 + $0x40] sm:$0xff] (!%p1056_p10)  ;;  %v398_v53 = vld [vmem:[%s1654_s0 + $0x50] sm:$0xff] (!%p1056_p10)  ;;  %v405_v56 = vld [vmem:[%s1654_s0 + $0x88] sm:$0xff] (!%p1056_p10) }
  0x45   : > { %1077 = vmatpush1.bf16.msra.mxu0 (!%p1056_p10), %v1076_v41  ;;  %v400_v52 = vld [vmem:[%s1654_s0 + $0x60] sm:$0xff] (!%p1056_p10)  ;;  %v402_v55 = vld [vmem:[%s1654_s0 + $0x70] sm:$0xff] (!%p1056_p10)  ;;  %v409_v57 = vld [vmem:[%s1654_s0 + $0xa8] sm:$0xff] (!%p1056_p10) }
  0x46   : > { %1089 = vmatpush1.bf16.msra.mxu1 (!%p1056_p10), %v1088_v45  ;;  %v1080_v54 = vpack.c.bf16 (!%p1056_p10), %v400_v52, %v396_v51  ;;  %1079 = vmatprep.subr.bf16.mxu0 (!%p1056_p10), %v1078_v49  ;;  %v1092_v58 = vpack.c.bf16 (!%p1056_p10), %v402_v55, %v398_v53  ;;  %v1082_v59 = vpack.c.bf16 (!%p1056_p10), %v409_v57, %v405_v56  ;;  %v407_v60 = vld [vmem:[%s1654_s0 + $0x98] sm:$0xff] (!%p1056_p10)  ;;  %v404_v62 = vld [vmem:[%s1654_s0 + $0x80] sm:$0xff] (!%p1056_p10)  ;;  %v406_v1 = vld [vmem:[%s1654_s0 + $0x90] sm:$0xff] (!%p1056_p10) }
  0x47   : > { %1091 = vmatprep.subr.bf16.mxu1 %v1090_v50  ;;  %v411_v61 = vld [vmem:[%s1654_s0 + $0xb8] sm:$0xff]  ;;  %v408_v0 = vld [vmem:[%s1654_s0 + $0xa0] sm:$0xff]  ;;  %v410_v2 = vld [vmem:[%s1654_s0 + $0xb0] sm:$0xff] }
  0x48   : > { %v1094_v63 = vpack.c.bf16 %v411_v61, %v407_v60  ;;  %v1084_v3 = vpack.c.bf16 %v408_v0, %v404_v62  ;;  %v1096_v4 = vpack.c.bf16 %v410_v2, %v406_v1  ;;  %v384_v5 = vld [vmem:[%s1655_s1] sm:$0xff]  ;;  %v385_v6 = vld [vmem:[%s1655_s1 + $0x8] sm:$0xff]  ;;  %v386_v7 = vld [vmem:[%s1655_s1 + $0x10] sm:$0xff] }
  0x49   : > { %1081 = vmatpush1.bf16.msra.mxu0 %v1080_v54  ;;  %v387_v8 = vld [vmem:[%s1655_s1 + $0x18] sm:$0xff]  ;;  %v620_v9 = vld [vmem:[%s1657_s3] sm:$0xff] }
  0x4a   : > { %1093 = vmatpush1.bf16.msra.mxu1 %v1092_v58  ;;  %1083 = vmatprep.subr.bf16.mxu0 %v1082_v59  ;;  %v619_v51 = vld [vmem:[%s1656_s2] sm:$0xff] }
  0x4b   : > { %1095 = vmatprep.subr.bf16.mxu1 %v1094_v63  ;;  %623 = vperm.xlu0 %1268, %v620_v9  }
  0x4d   : > { %1085 = vmatpush1.bf16.msra.mxu0 %v1084_v3 }
  0x4e   : > { %1097 = vmatpush1.bf16.msra.mxu1 %v1096_v4 }
  0x50   : > { %1057 = vmatmul.mubr.msk.f32.vlgmr.msra.gmra.mrb[0].mxu0 %vm412_vm0, %v384_v5 }
  0x51   : > { %1061 = vmatmul.mubr.msk.f32.vlgmr.msra.gmra.mrb[0].mxu1 %vm412_vm0, %v384_v5  ;;  %495 = vmatprep.mubr.f32.mxu0 %v1341_v39 }
  0x52   : > { %584 = vmatprep.mubr.f32.mxu1 %v1341_v39 }
  0x54   : > { %1058 = vmatmul.mubr.msk.f32.gmra.mrb[2].mxu0 %vm412_vm0, %v385_v6 }
  0x55   : > { %1062 = vmatmul.mubr.msk.f32.gmra.mrb[2].mxu1 %vm412_vm0, %v385_v6  ;;  %501 = vmatprep.mubr.f32.mxu0 %v1341_v39 }
  0x56   : > { %590 = vmatprep.mubr.f32.mxu1 %v1341_v39 }
  0x58   : > { %1059 = vmatmul.mubr.msk.f32.gmra.mrb[4].mxu0 %vm412_vm0, %v386_v7 }
  0x59   : > { %1063 = vmatmul.mubr.msk.f32.gmra.mrb[4].mxu1 %vm412_vm0, %v386_v7  ;;  %507 = vmatprep.mubr.f32.mxu0 %v1341_v39 }
  0x5a   : > { %596 = vmatprep.mubr.f32.mxu1 %v1341_v39 }
  0x5c   : > { %1060 = vmatmul.mubr.msk.f32.gmra.mrb[6].mxu0 %vm412_vm0, %v387_v8 }
  0x5d   : > { %1064 = vmatmul.mubr.msk.f32.gmra.mrb[6].mxu1 %vm412_vm0, %v387_v8  ;;  %694 = vmatprep.mubr.f32.mxu0 %v1341_v39 }
  0x5e   : > { %765 = vmatprep.mubr.f32.mxu1 %v1341_v39 }
  0xca   : > { %v624_v52 = vpop.permute.xlu0 %623 }
 0x123   : > { %v491_v11 = vpop.f32.mrb[0].mxu0 }
 0x124   : > { %v580_v12 = vpop.f32.mrb[0].mxu1  ;;  %v493_v13 = vpop.f32.mrb[1].mxu0  ;;  %v603_v16 = vmax.f32 %v491_v11, 0.0 }
 0x125   : > { %v582_v14 = vpop.f32.mrb[1].mxu1  ;;  %v605_v20 = vmax.f32 %v580_v12, 0.0  ;;  %v604_v21 = vmax.f32 %v493_v13, 0.0 }
 0x126   : > { %v606_v25 = vmax.f32 %v582_v14, 0.0 }
 0x127   : > { %v497_v15 = vpop.f32.mrb[2].mxu0 }
 0x128   : > { %v607_v17 = vmax.f32 %v497_v15, 0.0  ;;  %v586_v18 = vpop.f32.mrb[2].mxu1  ;;  %v499_v19 = vpop.f32.mrb[3].mxu0 }
 0x129   : > { %v609_v22 = vmax.f32 %v586_v18, 0.0  ;;  %v608_v23 = vmax.f32 %v499_v19, 0.0  ;;  %v588_v24 = vpop.f32.mrb[3].mxu1 }
 0x12a   : > { %v1100_v26 = vpack.c.bf16 %v607_v17, %v603_v16  ;;  %v610_v27 = vmax.f32 %v588_v24, 0.0 }
 0x12b   : > { %v1108_v28 = vpack.c.bf16 %v609_v22, %v605_v20  ;;  %v1098_v29 = vpack.c.bf16 %v608_v23, %v604_v21  ;;  %v503_v30 = vpop.f32.mrb[4].mxu0 }
 0x12c   : > { %v1106_v31 = vpack.c.bf16 %v610_v27, %v606_v25  ;;  %v592_v32 = vpop.f32.mrb[4].mxu1  ;;  %v505_v33 = vpop.f32.mrb[5].mxu0  ;;  %v611_v36 = vmax.f32 %v503_v30, 0.0 }
 0x12d   : > { %v594_v34 = vpop.f32.mrb[5].mxu1  ;;  %1099 = vmatprep.subr.bf16.mxu0 %v1098_v29  ;;  %v613_v40 = vmax.f32 %v592_v32, 0.0  ;;  %v612_v41 = vmax.f32 %v505_v33, 0.0 }
 0x12e   : > { %1107 = vmatprep.subr.bf16.mxu1 %v1106_v31  ;;  %1101 = vmatpush1.bf16.msra.mxu0 %v1100_v26  ;;  %v614_v45 = vmax.f32 %v594_v34, 0.0 }
 0x12f   : > { %1109 = vmatpush1.bf16.msra.mxu1 %v1108_v28  ;;  %v509_v35 = vpop.f32.mrb[6].mxu0 }
 0x130   : > { %v615_v37 = vmax.f32 %v509_v35, 0.0  ;;  %v598_v38 = vpop.f32.mrb[6].mxu1  ;;  %v511_v39 = vpop.f32.mrb[7].mxu0 }
 0x131   : > { %v617_v42 = vmax.f32 %v598_v38, 0.0  ;;  %v616_v43 = vmax.f32 %v511_v39, 0.0  ;;  %v600_v44 = vpop.f32.mrb[7].mxu1 }
 0x132   : > { %v1104_v46 = vpack.c.bf16 %v615_v37, %v611_v36  ;;  %v618_v47 = vmax.f32 %v600_v44, 0.0 }
 0x133   : > { %v1112_v48 = vpack.c.bf16 %v617_v42, %v613_v40  ;;  %v1102_v49 = vpack.c.bf16 %v616_v43, %v612_v41 }
 0x134   : > { %v1110_v50 = vpack.c.bf16 %v618_v47, %v614_v45 }
 0x135   : > { %1103 = vmatprep.subr.bf16.mxu0 %v1102_v49 }
 0x136   : > { %1111 = vmatprep.subr.bf16.mxu1 %v1110_v50  ;;  %1105 = vmatpush1.bf16.msra.mxu0 %v1104_v46 }
 0x137   : > { %1113 = vmatpush1.bf16.msra.mxu1 %v1112_v48 }
 0x139   : > { %1065 = vmatmul.mubr.msk.f32.vlgmr.msra.gmra.mrb[8].mxu0 %vm626_vm1, %v619_v51 }
 0x13a   : > { %1066 = vmatmul.mubr.msk.f32.vlgmr.msra.gmra.mrb[8].mxu1 %vm626_vm1, %v619_v51 }
 0x20c   : > { %v696_v53 = vpop.f32.mrb[8].mxu0 }
 0x20d   : > { %v767_v54 = vpop.f32.mrb[8].mxu1  ;;  %v697_v55 = vadd.f32 %v696_v53, %v624_v52  ;;  %v698_v56 = vpop.f32.mrb[9].mxu0 }
 0x20e   : > { %v768_v57 = vadd.f32 %v767_v54, %v624_v52  ;;  %v699_v58 = vadd.f32 %v698_v56, %v624_v52  ;;  %v769_v59 = vpop.f32.mrb[9].mxu1 }
 0x20f   : > { %772 = vst [vmem:[#allocation2] sm:$0xff] %v697_v55  ;;  %v770_v60 = vadd.f32 %v769_v59, %v624_v52 }
 0x210   : > { %774 = vst [vmem:[#allocation2 + $0x10] sm:$0xff] %v768_v57  ;;  %773 = vst [vmem:[#allocation2 + $0x8] sm:$0xff] %v699_v58 }
 0x211   : > { %775 = vst [vmem:[#allocation2 + $0x18] sm:$0xff] %v770_v60 }
 0x212 PF: > { %v1269_v61 = vld [vmem:[%s1485_s12 + $0x4] ss:$8 sps:$4 sm:$0xff]   ;;  %v1271_v62 = vld [vmem:[%s1485_s12] ss:$8 sps:$4 sm:$0xff]   ;;  %v1272_v63 = vld [vmem:[%s1485_s12 + $0x14] ss:$8 sps:$4 sm:$0xff]  }
 0x213   : > { %1115 = vmatprep.subr.bf16.mxu0 %v1269_v61  ;;  %1178 = vmatprep.subr.bf16.mxu1 %v1269_v61  ;;  %v1274_v0 = vld [vmem:[%s1485_s12 + $0x10] ss:$8 sps:$4 sm:$0xff]   ;;  %v1275_v1 = vld [vmem:[%s1485_s12 + $0x24] ss:$8 sps:$4 sm:$0xff]   ;;  %v1277_v2 = vld [vmem:[%s1485_s12 + $0x20] ss:$8 sps:$4 sm:$0xff]  }
 0x214   : > { %1117 = vmatpush1.bf16.msra.mxu0 %v1271_v62  ;;  %1194 = vmatpush1.bf16.msra.mxu1 %v1271_v62  ;;  %v1278_v3 = vld [vmem:[%s1485_s12 + $0x34] ss:$8 sps:$4 sm:$0xff]   ;;  %v1280_v4 = vld [vmem:[%s1485_s12 + $0x30] ss:$8 sps:$4 sm:$0xff]   ;;  %v1281_v5 = vld [vmem:[%s1485_s12 + $0x44] ss:$8 sps:$4 sm:$0xff]  }
 0x215   : > { %1119 = vmatprep.subr.bf16.mxu0 %v1272_v63  ;;  %1179 = vmatprep.subr.bf16.mxu1 %v1272_v63  ;;  %v1283_v6 = vld [vmem:[%s1485_s12 + $0x40] ss:$8 sps:$4 sm:$0xff]   ;;  %v1284_v7 = vld [vmem:[%s1485_s12 + $0x54] ss:$8 sps:$4 sm:$0xff]   ;;  %v1286_v8 = vld [vmem:[%s1485_s12 + $0x50] ss:$8 sps:$4 sm:$0xff]  }
 0x216   : > { %v1287_v9 = vld [vmem:[%s1485_s12 + $0x64] ss:$8 sps:$4 sm:$0xff]   ;;  %v1289_v12 = vld [vmem:[%s1485_s12 + $0x60] ss:$8 sps:$4 sm:$0xff]   ;;  %v1290_v13 = vld [vmem:[%s1485_s12 + $0x74] ss:$8 sps:$4 sm:$0xff]  }
 0x217   : > { %v873_v10 = vld [vmem:[#allocation2 + $0x8] sm:$0xff]  ;;  %v1292_v14 = vld [vmem:[%s1485_s12 + $0x70] ss:$8 sps:$4 sm:$0xff]   ;;  %v1296_v17 = vld [vmem:[%s1485_s12 + $0x94] ss:$8 sps:$4 sm:$0xff]  }
 0x218   : > { %1121 = vmatpush1.bf16.msra.mxu0 %v1274_v0  ;;  %1195 = vmatpush1.bf16.msra.mxu1 %v1274_v0  ;;  %v875_v11 = vld [vmem:[#allocation2 + $0x18] sm:$0xff]  ;;  %v1293_v15 = vld [vmem:[%s1485_s12 + $0x84] ss:$8 sps:$4 sm:$0xff]   ;;  %v1295_v16 = vld [vmem:[%s1485_s12 + $0x80] ss:$8 sps:$4 sm:$0xff]  }
 0x219   : > { %1123 = vmatprep.subr.bf16.mxu0 %v1275_v1  ;;  %1180 = vmatprep.subr.bf16.mxu1 %v1275_v1  ;;  %v1298_v18 = vld [vmem:[%s1485_s12 + $0x90] ss:$8 sps:$4 sm:$0xff]   ;;  %v1299_v19 = vld [vmem:[%s1485_s12 + $0xa4] ss:$8 sps:$4 sm:$0xff]   ;;  %v1301_v20 = vld [vmem:[%s1485_s12 + $0xa0] ss:$8 sps:$4 sm:$0xff]  }
 0x21a   : > { %940 = vmatprep.mubr.f32.mxu0 %v873_v10  ;;  %946 = vmatprep.mubr.f32.mxu1 %v875_v11  ;;  %v1302_v21 = vld [vmem:[%s1485_s12 + $0xb4] ss:$8 sps:$4 sm:$0xff]   ;;  %v1304_v22 = vld [vmem:[%s1485_s12 + $0xb0] ss:$8 sps:$4 sm:$0xff]   ;;  %v1305_v23 = vld [vmem:[%s1485_s12 + $0xc4] ss:$8 sps:$4 sm:$0xff]  }
 0x21b   : > { %v1307_v24 = vld [vmem:[%s1485_s12 + $0xc0] ss:$8 sps:$4 sm:$0xff]   ;;  %v1308_v25 = vld [vmem:[%s1485_s12 + $0xd4] ss:$8 sps:$4 sm:$0xff]   ;;  %v1310_v26 = vld [vmem:[%s1485_s12 + $0xd0] ss:$8 sps:$4 sm:$0xff]  }
 0x21c   : > { %1125 = vmatpush1.bf16.msra.mxu0 %v1277_v2  ;;  %1196 = vmatpush1.bf16.msra.mxu1 %v1277_v2  ;;  %v1311_v27 = vld [vmem:[%s1485_s12 + $0xe4] ss:$8 sps:$4 sm:$0xff]   ;;  %v1313_v28 = vld [vmem:[%s1485_s12 + $0xe0] ss:$8 sps:$4 sm:$0xff]   ;;  %v1314_v29 = vld [vmem:[%s1485_s12 + $0xf4] ss:$8 sps:$4 sm:$0xff]  }
 0x21d   : > { %1127 = vmatprep.subr.bf16.mxu0 %v1278_v3  ;;  %1181 = vmatprep.subr.bf16.mxu1 %v1278_v3  ;;  %v1316_v30 = vld [vmem:[%s1485_s12 + $0xf0] ss:$8 sps:$4 sm:$0xff]   ;;  %v872_v31 = vld [vmem:[#allocation2] sm:$0xff]  ;;  %s1073_s12 = sshll.u32 (%p1404_p5), %s1389_s21, 4 }
 0x21e   : > { %v874_v32 = vld [vmem:[#allocation2 + $0x10] sm:$0xff]  ;;  %s966_s27 = scalar_lea.vmem (%p1404_p5), %s1659_s5, %s1073_s12 }
 0x220   : > { %1129 = vmatpush1.bf16.msra.mxu0 %v1280_v4  ;;  %1197 = vmatpush1.bf16.msra.mxu1 %v1280_v4 }
 0x221   : > { %1131 = vmatprep.subr.bf16.mxu0 %v1281_v5  ;;  %1182 = vmatprep.subr.bf16.mxu1 %v1281_v5 }
 0x224   : > { %1133 = vmatpush1.bf16.msra.mxu0 %v1283_v6  ;;  %1198 = vmatpush1.bf16.msra.mxu1 %v1283_v6 }
 0x225   : > { %1135 = vmatprep.subr.bf16.mxu0 %v1284_v7  ;;  %1183 = vmatprep.subr.bf16.mxu1 %v1284_v7 }
 0x228   : > { %1137 = vmatpush1.bf16.msra.mxu0 %v1286_v8  ;;  %1199 = vmatpush1.bf16.msra.mxu1 %v1286_v8 }
 0x229   : > { %1139 = vmatprep.subr.bf16.mxu0 %v1287_v9  ;;  %1184 = vmatprep.subr.bf16.mxu1 %v1287_v9 }
 0x22c   : > { %1141 = vmatpush1.bf16.msra.mxu0 %v1289_v12  ;;  %1200 = vmatpush1.bf16.msra.mxu1 %v1289_v12 }
 0x22d   : > { %1143 = vmatprep.subr.bf16.mxu0 %v1290_v13  ;;  %1185 = vmatprep.subr.bf16.mxu1 %v1290_v13 }
 0x230   : > { %1145 = vmatpush1.bf16.msra.mxu0 %v1292_v14  ;;  %1201 = vmatpush1.bf16.msra.mxu1 %v1292_v14 }
 0x231   : > { %1147 = vmatprep.subr.bf16.mxu0 %v1293_v15  ;;  %1186 = vmatprep.subr.bf16.mxu1 %v1293_v15 }
 0x234   : > { %1149 = vmatpush1.bf16.msra.mxu0 %v1295_v16  ;;  %1202 = vmatpush1.bf16.msra.mxu1 %v1295_v16 }
 0x235   : > { %1151 = vmatprep.subr.bf16.mxu0 %v1296_v17  ;;  %1187 = vmatprep.subr.bf16.mxu1 %v1296_v17 }
 0x238   : > { %1153 = vmatpush1.bf16.msra.mxu0 %v1298_v18  ;;  %1203 = vmatpush1.bf16.msra.mxu1 %v1298_v18 }
 0x239   : > { %1155 = vmatprep.subr.bf16.mxu0 %v1299_v19  ;;  %1188 = vmatprep.subr.bf16.mxu1 %v1299_v19 }
 0x23c   : > { %1157 = vmatpush1.bf16.msra.mxu0 %v1301_v20  ;;  %1204 = vmatpush1.bf16.msra.mxu1 %v1301_v20 }
 0x23d   : > { %1159 = vmatprep.subr.bf16.mxu0 %v1302_v21  ;;  %1189 = vmatprep.subr.bf16.mxu1 %v1302_v21 }
 0x240   : > { %1161 = vmatpush1.bf16.msra.mxu0 %v1304_v22  ;;  %1205 = vmatpush1.bf16.msra.mxu1 %v1304_v22 }
 0x241   : > { %1163 = vmatprep.subr.bf16.mxu0 %v1305_v23  ;;  %1190 = vmatprep.subr.bf16.mxu1 %v1305_v23 }
 0x244   : > { %1165 = vmatpush1.bf16.msra.mxu0 %v1307_v24  ;;  %1206 = vmatpush1.bf16.msra.mxu1 %v1307_v24 }
 0x245   : > { %1167 = vmatprep.subr.bf16.mxu0 %v1308_v25  ;;  %1191 = vmatprep.subr.bf16.mxu1 %v1308_v25 }
 0x248   : > { %1169 = vmatpush1.bf16.msra.mxu0 %v1310_v26  ;;  %1207 = vmatpush1.bf16.msra.mxu1 %v1310_v26 }
 0x249   : > { %1171 = vmatprep.subr.bf16.mxu0 %v1311_v27  ;;  %1192 = vmatprep.subr.bf16.mxu1 %v1311_v27 }
 0x24c   : > { %1173 = vmatpush1.bf16.msra.mxu0 %v1313_v28  ;;  %1208 = vmatpush1.bf16.msra.mxu1 %v1313_v28 }
 0x24d   : > { %1175 = vmatprep.subr.bf16.mxu0 %v1314_v29  ;;  %1193 = vmatprep.subr.bf16.mxu1 %v1314_v29 }
 0x250   : > { %1177 = vmatpush1.bf16.msra.mxu0 %v1316_v30  ;;  %1209 = vmatpush1.bf16.msra.mxu1 %v1316_v30 }
 0x253   : > { %941 = vmatmul.mubr.f32.vlgmr.msra.gmra.mrb[0].mxu0 %v872_v31  ;;  %947 = vmatmul.mubr.f32.vlgmr.msra.gmra.mrb[0].mxu1 %v874_v32 }
 0x322   : > { %963 = sbr.rel (!%p1404_p5) target bundleno = 817 (0x331), region = 86 }
 0x326   : > { %v942_v33 = vpop.f32.mrb[0].mxu0  ;;  %v948_v34 = vpop.f32.mrb[0].mxu1 }
 0x327   : > { %953 = vst [vmem:[%s1487_s13] sm:$0xff] %v942_v33  ;;  %955 = vst [vmem:[%s1487_s13 + $0x10] sm:$0xff] %v948_v34  ;;  %v944_v35 = vpop.f32.mrb[1].mxu0  ;;  %v950_v36 = vpop.f32.mrb[1].mxu1 }
 0x328   : > { %954 = vst [vmem:[%s1487_s13 + $0x8] sm:$0xff] %v944_v35  ;;  %956 = vst [vmem:[%s1487_s13 + $0x18] sm:$0xff] %v950_v36 }
 0x32e   : > { %v979_v37 = vld [vmem:[%s1487_s13] sm:$0xff]  ;;  %v983_v39 = vld [vmem:[%s1487_s13 + $0x10] sm:$0xff] }
 0x32f   : > { %v981_v38 = vld [vmem:[%s1487_s13 + $0x8] sm:$0xff]  ;;  %v985_v40 = vld [vmem:[%s1487_s13 + $0x18] sm:$0xff]  ;;  %980 = vst [vmem:[%s966_s27] sm:$0xff] %v979_v37  ;;  %984 = vst [vmem:[%s966_s27 + $0x40] sm:$0xff] %v983_v39 }
 0x330   : > { %982 = vst [vmem:[%s966_s27 + $0x8] sm:$0xff] %v981_v38  ;;  %986 = vst [vmem:[%s966_s27 + $0x48] sm:$0xff] %v985_v40 }
 0x331 PF: > { %p12_p11 = scmp.ge.s32.totalorder %s1392_s22, 6   ;;  %s1661_s18 = smov %s1335_s19 }
 0x332   : > { %s1662_s19 = smov %s1402_s25  ;;  %s1663_s20 = smov %s1392_s22 }
 0x333   :  { %14 = sbr.rel (!%p12_p11) target bundleno = 2 (0x2), region = 140 }

</bundles_post_ra>
